<compile_context>
chip_gen: v6e
topology: v6e:2x2x1
jax: 0.10.0
libtpu: 0.0.40
codegen_flags: <defaults>
</compile_context>

<pallas_src>
import jax
import jax.numpy as jnp
from jax import lax
from jax.experimental import pallas as pl
from jax.experimental.pallas import tpu as pltpu


def _round_up(x, m):
    return ((x + m - 1) // m) * m


# --------------------------------------------------------------------------- #
# Kernel A: per-edge compute (runs once per E tile, independent of B)
#   r_ki = sigmoid(h_ki @ Wr_h + mess_ki @ Wr_m + br)
#   scat_in = [mess_ki, r_ki * mess_ki]          (bf16, [E_t, 2*D_p])
# --------------------------------------------------------------------------- #
def edge_kernel(h_ki_ref, mess_ki_ref, wr_h_ref, wr_m_ref, br_ref, scat_in_ref):
    d_p = mess_ki_ref.shape[1]
    mess_bf = mess_ki_ref[...]                                    # bf16 [E_t, D_p]
    r_ki = jax.nn.sigmoid(
        jnp.dot(h_ki_ref[...], wr_h_ref[...], preferred_element_type=jnp.float32)
        + jnp.dot(mess_bf, wr_m_ref[...], preferred_element_type=jnp.float32)
        + br_ref[...])                                            # f32 [E_t, D_p]
    scat_in_ref[:, :d_p] = mess_bf
    scat_in_ref[:, d_p:] = (r_ki * mess_bf.astype(jnp.float32)).astype(
        scat_in_ref.dtype)


# --------------------------------------------------------------------------- #
# Kernel B: scatter-sum of scat_in rows into B rows (one-hot matmul).
#   Output block is resident across the "arbitrary" E axis -> accumulate into it.
# --------------------------------------------------------------------------- #
def scatter_kernel(src_ref, scat_in_ref, sr_ref):
    b_blk = pl.program_id(0)
    k = pl.program_id(1)
    b_t = sr_ref.shape[0]
    e_t = scat_in_ref.shape[0]

    @pl.when(k == 0)
    def _init():
        sr_ref[...] = jnp.zeros_like(sr_ref)

    row_ids = lax.broadcasted_iota(jnp.int32, (b_t, e_t), 0) + b_blk * b_t
    scat = (row_ids == src_ref[...]).astype(jnp.bfloat16)         # [B_t, E_t]
    sr_ref[...] += jnp.dot(scat, scat_in_ref[...],
                           preferred_element_type=jnp.float32)


# --------------------------------------------------------------------------- #
# Kernel C: GRU-style gate + blend (finalize), consumes the [B_p, 2*D_p] sums.
# --------------------------------------------------------------------------- #
def gru_kernel(h_ij_ref, sr_ref, wz_h_ref, wz_m_ref, bz_ref,
               w_ref, u_ref, bw_ref, out_ref):
    d_p = out_ref.shape[1]
    s_ij = sr_ref[:, :d_p]                                        # f32
    r_ij = sr_ref[:, d_p:]                                        # f32
    h_bf = h_ij_ref[...]                                          # bf16
    z_ij = jax.nn.sigmoid(
        jnp.dot(h_bf, wz_h_ref[...], preferred_element_type=jnp.float32)
        + jnp.dot(s_ij.astype(jnp.bfloat16), wz_m_ref[...],
                  preferred_element_type=jnp.float32)
        + bz_ref[...])
    m_ij = jnp.tanh(
        jnp.dot(h_bf, w_ref[...], preferred_element_type=jnp.float32)
        + jnp.dot(r_ij.astype(jnp.bfloat16), u_ref[...],
                  preferred_element_type=jnp.float32)
        + bw_ref[...])
    out_ref[...] = ((1.0 - z_ij) * s_ij + z_ij * m_ij).astype(out_ref.dtype)


# --------------------------------------------------------------------------- #
# Wrapper
# --------------------------------------------------------------------------- #
def dmpnn_layer_pallas(h_ij, h_ki, mess, src_idx, nei_idx, params,
                       *, b_tile=256, e_tile=512,
                       vmem_limit_bytes=48 * 1024 * 1024):
    B, F = h_ij.shape
    E = h_ki.shape[0]
    M, D = mess.shape

    F_p = _round_up(F, 128)
    D_p = _round_up(D, 128)
    e_tile = max(128, min(e_tile, _round_up(E, 128)))   # lane-dense src / one-hot
    b_tile = max(8, min(b_tile, _round_up(B, 8)))       # sublane multiple
    E_p = _round_up(E, e_tile)
    B_p = _round_up(B, b_tile)
    n_e = E_p // e_tile
    n_b = B_p // b_tile

    f32, bf16 = jnp.float32, jnp.bfloat16

    # ---- gather in the wrapper (XLA), then pad + pre-cast MXU operands to bf16
    mess_ki = jnp.take(mess.astype(f32), nei_idx.astype(jnp.int32), axis=0)  # [E, D]
    mess_ki_p = jnp.zeros((E_p, D_p), bf16).at[:E, :D].set(mess_ki.astype(bf16))
    h_ki_p = jnp.zeros((E_p, F_p), bf16).at[:E, :F].set(h_ki.astype(bf16))
    h_ij_p = jnp.zeros((B_p, F_p), bf16).at[:B, :F].set(h_ij.astype(bf16))
    # padded edges get src = -1 -> never match any output row
    src_p = jnp.full((1, E_p), -1, jnp.int32).at[0, :E].set(src_idx.astype(jnp.int32))

    def pad_w(w, k_pad):
        kk, nn = w.shape
        return jnp.zeros((k_pad, D_p), bf16).at[:kk, :nn].set(w.astype(bf16))

    def pad_b(b):
        return jnp.zeros((1, D_p), f32).at[:, :D].set(b.astype(f32).reshape(1, D))

    wr_h = pad_w(params["wr_h"], F_p); wr_m = pad_w(params["wr_m"], D_p)
    wz_h = pad_w(params["wz_h"], F_p); wz_m = pad_w(params["wz_m"], D_p)
    w_ = pad_w(params["w"], F_p);      u_ = pad_w(params["u"], D_p)
    br = pad_b(params["br"]); bz = pad_b(params["bz"]); bw = pad_b(params["bw"])

    # ---------------- Kernel A: per-edge compute (once, independent of B) -----
    scat_in = pl.pallas_call(
        edge_kernel,
        out_shape=jax.ShapeDtypeStruct((E_p, 2 * D_p), bf16),
        grid=(n_e,),
        in_specs=[
            pl.BlockSpec((e_tile, F_p), lambda k: (k, 0)),     # h_ki (bf16)
            pl.BlockSpec((e_tile, D_p), lambda k: (k, 0)),     # mess_ki (bf16)
            pl.BlockSpec((F_p, D_p), lambda k: (0, 0)),        # Wr_h
            pl.BlockSpec((D_p, D_p), lambda k: (0, 0)),        # Wr_m
            pl.BlockSpec((1, D_p), lambda k: (0, 0)),          # br (f32)
        ],
        out_specs=pl.BlockSpec((e_tile, 2 * D_p), lambda k: (k, 0)),
        compiler_params=pltpu.CompilerParams(
            dimension_semantics=("parallel",),
            vmem_limit_bytes=vmem_limit_bytes),
        cost_estimate=pl.CostEstimate(
            flops=int(2 * E_p * (F_p + D_p) * D_p),
            transcendentals=int(E_p * D_p),
            bytes_accessed=int(2 * (E_p * F_p + E_p * D_p + (F_p + D_p) * D_p
                                    + E_p * 2 * D_p) + 4 * D_p)),
    )(h_ki_p, mess_ki_p, wr_h, wr_m, br)

    # ---------------- Kernel B: scatter-sum over the E axis -------------------
    sr = pl.pallas_call(
        scatter_kernel,
        out_shape=jax.ShapeDtypeStruct((B_p, 2 * D_p), f32),
        grid=(n_b, n_e),
        in_specs=[
            pl.BlockSpec((1, e_tile), lambda i, k: (0, k)),          # src (lane-dense)
            pl.BlockSpec((e_tile, 2 * D_p), lambda i, k: (k, 0)),    # scat_in (bf16)
        ],
        out_specs=pl.BlockSpec((b_tile, 2 * D_p), lambda i, k: (i, 0)),
        compiler_params=pltpu.CompilerParams(
            dimension_semantics=("parallel", "arbitrary"),
            vmem_limit_bytes=vmem_limit_bytes),
        cost_estimate=pl.CostEstimate(
            flops=int(2 * B_p * E_p * 2 * D_p),
            transcendentals=0,
            bytes_accessed=int(4 * E_p + n_b * E_p * 2 * D_p * 2
                               + B_p * 2 * D_p * 4)),
    )(src_p, scat_in)

    # ---------------- Kernel C: GRU gate / blend (finalize) -------------------
    out_p = pl.pallas_call(
        gru_kernel,
        out_shape=jax.ShapeDtypeStruct((B_p, D_p), f32),
        grid=(n_b,),
        in_specs=[
            pl.BlockSpec((b_tile, F_p), lambda i: (i, 0)),       # h_ij (bf16)
            pl.BlockSpec((b_tile, 2 * D_p), lambda i: (i, 0)),   # [s_ij, r_ij] (f32)
            pl.BlockSpec((F_p, D_p), lambda i: (0, 0)),          # Wz_h
            pl.BlockSpec((D_p, D_p), lambda i: (0, 0)),          # Wz_m
            pl.BlockSpec((1, D_p), lambda i: (0, 0)),            # bz
            pl.BlockSpec((F_p, D_p), lambda i: (0, 0)),          # W
            pl.BlockSpec((D_p, D_p), lambda i: (0, 0)),          # U
            pl.BlockSpec((1, D_p), lambda i: (0, 0)),            # bw
        ],
        out_specs=pl.BlockSpec((b_tile, D_p), lambda i: (i, 0)),
        compiler_params=pltpu.CompilerParams(
            dimension_semantics=("parallel",),
            vmem_limit_bytes=vmem_limit_bytes),
        cost_estimate=pl.CostEstimate(
            flops=int(4 * B_p * (F_p + D_p) * D_p),
            transcendentals=int(2 * B_p * D_p),
            bytes_accessed=int(2 * B_p * F_p + 4 * B_p * 3 * D_p
                               + 2 * 2 * (F_p + D_p) * D_p + 8 * D_p)),
    )(h_ij_p, sr, wz_h, wz_m, bz, w_, u_, bw)

    return out_p[:B, :D]


# --------------------------------------------------------------------------- #
# Pure-JAX f32 reference matching the PyTorch forward semantics.
# --------------------------------------------------------------------------- #
def dmpnn_layer_ref(h_ij, h_ki, mess, src_idx, nei_idx, params):
    B = h_ij.shape[0]
    mess_ki = mess[nei_idx]
    s_ij = jax.ops.segment_sum(mess_ki, src_idx, num_segments=B)
    z_ij = jax.nn.sigmoid(h_ij @ params["wz_h"] + s_ij @ params["wz_m"] + params["bz"])
    r_ki = jax.nn.sigmoid(h_ki @ params["wr_h"] + mess_ki @ params["wr_m"] + params["br"])
    r_ij = jax.ops.segment_sum(r_ki * mess_ki, src_idx, num_segments=B)
    m_ij = jnp.tanh(h_ij @ params["w"] + params["bw"] + r_ij @ params["u"])
    return (1.0 - z_ij) * s_ij + z_ij * m_ij


def init_params(key, f_node, f_bond, d_model):
    """Deterministic synthetic init. Weights stored pre-transposed as [in, out]."""
    F = f_node + f_bond
    ks = jax.random.split(key, 8)
    s_in1 = 1.0 / jnp.sqrt(F + d_model)
    s_in2 = 1.0 / jnp.sqrt(F)
    s_d = 1.0 / jnp.sqrt(d_model)
    wz = jax.random.uniform(ks[0], (F + d_model, d_model), jnp.float32, -s_in1, s_in1)
    wr = jax.random.uniform(ks[1], (F + d_model, d_model), jnp.float32, -s_in1, s_in1)
    return {
        "wz_h": wz[:F], "wz_m": wz[F:],
        "bz": jax.random.uniform(ks[2], (1, d_model), jnp.float32, -s_in1, s_in1),
        "wr_h": wr[:F], "wr_m": wr[F:],
        "br": jax.random.uniform(ks[3], (1, d_model), jnp.float32, -s_in1, s_in1),
        "u": jax.random.uniform(ks[4], (d_model, d_model), jnp.float32, -s_d, s_d),
        "w": jax.random.uniform(ks[5], (F, d_model), jnp.float32, -s_in2, s_in2),
        "bw": jax.random.uniform(ks[6], (1, d_model), jnp.float32, -s_in2, s_in2),
    }


if __name__ == "__main__":
    f_node, f_bond, d_model = 16, 16, 32
    F = f_node + f_bond
    bond_num = 40     # B: number of directed bonds (output rows)
    n_edges = 200     # E: number of (k->i) neighbor relations
    mess_rows = 40    # M: rows of incoming message tensor

    key = jax.random.PRNGKey(0)
    k_h_ij, k_h_ki, k_mess, k_src, k_nei, k_par = jax.random.split(key, 6)

    h_ij = jax.random.normal(k_h_ij, (bond_num, F), jnp.float32)
    h_ki = jax.random.normal(k_h_ki, (n_edges, F), jnp.float32)
    mess = jax.random.normal(k_mess, (mess_rows, d_model), jnp.float32)
    src_idx = jax.random.randint(k_src, (n_edges,), 0, bond_num, jnp.int32)
    nei_idx = jax.random.randint(k_nei, (n_edges,), 0, mess_rows, jnp.int32)

    params = init_params(k_par, f_node, f_bond, d_model)

    # small tiles so the multi-block (parallel B) and multi-step (E reduction)
    # paths are exercised even at these small test shapes
    out = dmpnn_layer_pallas(h_ij, h_ki, mess, src_idx, nei_idx, params,
                             b_tile=16, e_tile=128)
    out = jax.block_until_ready(out)

    ref = dmpnn_layer_ref(h_ij, h_ki, mess, src_idx, nei_idx, params)
    assert out.shape == (bond_num, d_model)
    rel_err = jnp.linalg.norm(out - ref) / jnp.linalg.norm(ref)
    max_err = jnp.max(jnp.abs(out - ref))
    # bf16 MXU inputs (f32 accumulation) -> looser tolerance than a pure-f32 check
    assert rel_err < 2e-2 and max_err < 1.5e-1, (
        f"rel err {rel_err}, max abs diff {max_err}")
    print("KERNEL_OK")
</pallas_src>

<mosaic_0001>
module attributes {stable_mosaic.version = 11 : i64} {
  func.func @edge_kernel(%arg0: i32, %arg1: memref<128x128xbf16, #tpu.memory_space<vmem>>, %arg2: memref<128x128xbf16, #tpu.memory_space<vmem>>, %arg3: memref<128x128xbf16, #tpu.memory_space<vmem>>, %arg4: memref<128x128xbf16, #tpu.memory_space<vmem>>, %arg5: memref<1x128xf32, #tpu.memory_space<vmem>>, %arg6: memref<128x256xbf16, #tpu.memory_space<vmem>>) attributes {dimension_semantics = [#tpu.dimension_semantics<parallel>], iteration_bounds = array<i64: 2>, scalar_prefetch = 0 : i64, scratch_operands = 0 : i64, tpu.core_type = #tpu.core_type<tc>, window_params = [{transform_indices = @transform_0, window_bounds = array<i64: 128, 128>}, {transform_indices = @transform_1, window_bounds = array<i64: 128, 128>}, {pipeline_mode = #tpu.pipeline_mode<synchronous>, transform_indices = @transform_2, window_bounds = array<i64: 128, 128>}, {pipeline_mode = #tpu.pipeline_mode<synchronous>, transform_indices = @transform_3, window_bounds = array<i64: 128, 128>}, {pipeline_mode = #tpu.pipeline_mode<synchronous>, transform_indices = @transform_4, window_bounds = array<i64: 1, 128>}, {transform_indices = @transform_5, window_bounds = array<i64: 128, 256>}]} {
    %c0 = arith.constant 0 : index
    %c0_0 = arith.constant 0 : index
    %0 = vector.load %arg2[%c0, %c0_0] : memref<128x128xbf16, #tpu.memory_space<vmem>>, vector<128x128xbf16>
    %c0_1 = arith.constant 0 : index
    %c0_2 = arith.constant 0 : index
    %1 = vector.load %arg1[%c0_1, %c0_2] : memref<128x128xbf16, #tpu.memory_space<vmem>>, vector<128x128xbf16>
    %c0_3 = arith.constant 0 : index
    %c0_4 = arith.constant 0 : index
    %2 = vector.load %arg3[%c0_3, %c0_4] : memref<128x128xbf16, #tpu.memory_space<vmem>>, vector<128x128xbf16>
    %cst = arith.constant dense<0.000000e+00> : vector<128x128xf32>
    %3 = tpu.matmul %1, %2, %cst {dimension_numbers = #tpu.dot_dimension_numbers<[1], [0], [0], [1], [0, 0, 1, 1], [], []>} : vector<128x128xbf16>, vector<128x128xbf16>, vector<128x128xf32> -> vector<128x128xf32>
    %c0_5 = arith.constant 0 : index
    %c0_6 = arith.constant 0 : index
    %4 = vector.load %arg4[%c0_5, %c0_6] : memref<128x128xbf16, #tpu.memory_space<vmem>>, vector<128x128xbf16>
    %cst_7 = arith.constant dense<0.000000e+00> : vector<128x128xf32>
    %5 = tpu.matmul %0, %4, %cst_7 {dimension_numbers = #tpu.dot_dimension_numbers<[1], [0], [0], [1], [0, 0, 1, 1], [], []>} : vector<128x128xbf16>, vector<128x128xbf16>, vector<128x128xf32> -> vector<128x128xf32>
    %6 = arith.addf %3, %5 : vector<128x128xf32>
    %c0_8 = arith.constant 0 : index
    %c0_9 = arith.constant 0 : index
    %7 = vector.load %arg5[%c0_8, %c0_9] : memref<1x128xf32, #tpu.memory_space<vmem>>, vector<1x128xf32>
    %8 = vector.broadcast %7 : vector<1x128xf32> to vector<128x128xf32>
    %9 = arith.addf %6, %8 : vector<128x128xf32>
    %10 = arith.negf %9 : vector<128x128xf32>
    %11 = math.exp %10 : vector<128x128xf32>
    %cst_10 = arith.constant 1.000000e+00 : f32
    %12 = vector.broadcast %cst_10 : f32 to vector<128x128xf32>
    %13 = arith.addf %12, %11 : vector<128x128xf32>
    %14 = arith.divf %12, %13 : vector<128x128xf32>
    %c0_11 = arith.constant 0 : index
    %c0_12 = arith.constant 0 : index
    %15 = vector.load %arg6[%c0_11, %c0_12] : memref<128x256xbf16, #tpu.memory_space<vmem>>, vector<128x128xbf16>
    tpu.vector_store %arg6[%c0_11, %c0_12], %0 {strides = array<i32>} : memref<128x256xbf16, #tpu.memory_space<vmem>>, vector<128x128xbf16>,
    %16 = arith.extf %0 : vector<128x128xbf16> to vector<128x128xf32>
    %17 = arith.mulf %14, %16 : vector<128x128xf32>
    %18 = arith.truncf %17 : vector<128x128xf32> to vector<128x128xbf16>
    %c0_13 = arith.constant 0 : index
    %c128 = arith.constant 128 : index
    %19 = vector.load %arg6[%c0_13, %c128] : memref<128x256xbf16, #tpu.memory_space<vmem>>, vector<128x128xbf16>
    tpu.vector_store %arg6[%c0_13, %c128], %18 {strides = array<i32>} : memref<128x256xbf16, #tpu.memory_space<vmem>>, vector<128x128xbf16>,
    return
  }
  func.func @transform_0(%arg0: i32) -> (i32, i32) {
    %c0_i32 = arith.constant 0 : i32
    %c0_i32_0 = arith.constant 0 : i32
    return %arg0, %c0_i32 : i32, i32
  }
  func.func @transform_1(%arg0: i32) -> (i32, i32) {
    %c0_i32 = arith.constant 0 : i32
    %c0_i32_0 = arith.constant 0 : i32
    return %arg0, %c0_i32 : i32, i32
  }
  func.func @transform_2(%arg0: i32) -> (i32, i32) {
    %c0_i32 = arith.constant 0 : i32
    %c0_i32_0 = arith.constant 0 : i32
    %c0_i32_1 = arith.constant 0 : i32
    return %c0_i32, %c0_i32_0 : i32, i32
  }
  func.func @transform_3(%arg0: i32) -> (i32, i32) {
    %c0_i32 = arith.constant 0 : i32
    %c0_i32_0 = arith.constant 0 : i32
    %c0_i32_1 = arith.constant 0 : i32
    return %c0_i32, %c0_i32_0 : i32, i32
  }
  func.func @transform_4(%arg0: i32) -> (i32, i32) {
    %c0_i32 = arith.constant 0 : i32
    %c0_i32_0 = arith.constant 0 : i32
    %c0_i32_1 = arith.constant 0 : i32
    return %c0_i32, %c0_i32_0 : i32, i32
  }
  func.func @transform_5(%arg0: i32) -> (i32, i32) {
    %c0_i32 = arith.constant 0 : i32
    %c0_i32_0 = arith.constant 0 : i32
    return %arg0, %c0_i32 : i32, i32
  }
}

</mosaic_0001>

<bundles_post_ra>
// kernel: tpu_custom_call.1
= control target key start
LH: loop header
LB: loop body
LE: loop exit
PB: predicated region body
PF: predicated region fallthrough
CT: control target
= control target key end

     0   :  { %s2157_s0 = inlined_call_operand.hbm [shape: bf16[256,128], index: 0, kind: input, shape index: {}]   ;;  %s2158_s1 = inlined_call_operand.hbm [shape: bf16[256,128], index: 1, kind: input, shape index: {}]   ;;  %s2159_s2 = inlined_call_operand.hbm [shape: bf16[128,128], index: 2, kind: input, shape index: {}]   ;;  %s2160_s3 = inlined_call_operand.hbm [shape: bf16[128,128], index: 3, kind: input, shape index: {}]   ;;  %s2161_s4 = inlined_call_operand.vmem [shape: f32[1,128], index: 4, kind: input, shape index: {}]   ;;  %s2162_s5 = inlined_call_operand.hbm [shape: bf16[256,256], index: 5, kind: output, shape index: {}]  }
   0x1   :  { %2170 = sst [smem:[#allocation16_spill]] %s2157_s0 }
   0x2   :  { %2171 = sst [smem:[#allocation17_spill]] %s2159_s2 }
   0x3   :  { %10 = vsyncpa [#allocation3], 0 }
   0x4   :  { %12 = vsyncpa [#allocation3 + $0x1], 0 }
   0x5   :  { %13 = vsyncpa [#allocation6], 0 }
   0x6   :  { %15 = vsyncpa [#allocation6 + $0x1], 0 }
   0x7   :  { %16 = vsyncpa [#allocation9], 0 }
   0x8   :  { %17 = vsyncpa [#allocation4], 0 }
   0x9   :  { %19 = vsyncpa [#allocation4 + $0x1], 0  ;;  %s1744_s18 = smov 0   ;;  %s1746_s19 = smov 0  }
   0xa   :  { %s1748_s20 = smov 0   ;;  %s1750_s21 = smov 0  }
   0xb LB: > { %s1765_s22 = sadd.s32 4294967295, %s1703_s21   ;;  %s1143_s23 = sadd.s32 4294967294, %s1703_s21   ;;  %s1703_s21 = sphi %s1750_s21, %s2193_s21   ;;  %s1699_s20 = sphi %s1748_s20, %s2192_s20   ;;  %s1695_s19 = sphi %s1746_s19, %s2191_s19   ;;  %s1691_s18 = sphi %s1744_s18, %s2190_s18  }
   0xc   : > { %p45_p0 = scmp.ne.s32.totalorder %s1695_s19, %s1691_s18  ;;  %p2167_p1 = scmp.eq.s32.totalorder %s1765_s22, 0 }
   0xd   : > { %p158_p2 = scmp.eq.s32.totalorder %s1765_s22, 1  ;;  %p164_p3 = scmp.eq.s32.totalorder %s1143_s23, 1 }
   0xe   : > { %p1774_p4 = por %p2167_p1, %p45_p0  ;;  %p1144_p5 = scmp.ge.s32.totalorder %s1703_s21, 1 }
   0xf   : > { %p1779_p6 = por %p164_p3, %p45_p0  ;;  %p171_p7 = scmp.lt.s32.totalorder %s1703_s21, 3 }
  0x10   : > { %s2172_s24 = scalar_select %p1774_p4, 1, 0 }
  0x11   : > { %s2173_s25 = scalar_select %p1779_p6, 1, 0 }
  0x12   : > { %p1784_p8 = pnand %p1144_p5, %p171_p7  ;;  %s1705_s27 = smov [#allocation7]  }
  0x13   : > { %s183_s28 = sshll.u32 %s1705_s27, 4  ;;  %s1706_s30 = smov [#allocation8]   ;;  %s184_s28 = int_to_ptr.vmem [resolvable:$true] %s183_s28 }
  0x14   : > { %p1361_p9 = pneg %p1784_p8  ;;  %s196_s6 = sshll.u32 %s1706_s30, 4  ;;  %s197_s6 = int_to_ptr.vmem [resolvable:$true] %s196_s6 }
  0x15   : > { %s1530_s7 = scalar_lea.vmem %s184_s28, 1024  ;;  %p1538_p5 = scmp.lt.s32.totalorder %s184_s28, %s184_s28 }
  0x16   : > { %p1793_p11 = pnand %p1361_p9, %p2167_p1  ;;  %p1531_p13 = scmp.ne.s32.totalorder %s184_s28, %s1530_s7 }
  0x17   : > { %p1539_p7 = scmp.lt.s32.totalorder %s1530_s7, %s1530_s7 }
  0x18   : > { %p1521_p12 = pneg %p1793_p11 }
  0x19   : > { %p1540_p10 = por %p1539_p7, %p1538_p5 }
  0x1a   : > { %p1533_p0 = pnand %p1531_p13, %p1521_p12 }
  0x1c   : > { %p1534_p3 = pneg %p1533_p0 }
  0x1e   : > { %p1541_p9 = pnand %p1540_p10, %p1534_p3 }
  0x20   : > { %1544 = shalt.err (!%p1541_p9)
}
  0x21   : > { %s2163_s8 = smov 64   ;;  %s2165_s9 = smov 4  }
  0x22   : > { %s2176_s2 = sld [smem:[#allocation17_spill]]  ;;  %s1556_s12 = scalar_lea.vmem %s197_s6, 1024 }
  0x23   : > { %p1557_p13 = scmp.ne.s32.totalorder %s197_s6, %s1556_s12  ;;  %p1564_p10 = scmp.lt.s32.totalorder %s197_s6, %s197_s6 }
  0x24   : > { %p1565_p3 = scmp.lt.s32.totalorder %s1556_s12, %s1556_s12 }
  0x25   : > { %p1559_p0 = pnand %p1557_p13, %p1521_p12 }
  0x26   : > { %p1566_p7 = por %p1565_p3, %p1564_p10 }
  0x27   : > { %p1560_p5 = pneg %p1559_p0 }
  0x28   : > { %1364 = dma.hbm_to_vmem [thread:$0]  (!%p1793_p11), %s2176_s2, 1024, %s184_s28, [#allocation6], %s2163_s8, %s2163_s8, %s2165_s9  }
  0x29   : > { %p1567_p9 = pnand %p1566_p7, %p1560_p5 }
  0x2b   : > { %1570 = shalt.err (!%p1567_p9)
}
  0x2c   : > { %1367 = dma.hbm_to_vmem [thread:$0]  (!%p1793_p11), %s2160_s3, 1024, %s197_s6, [#allocation9], %s2163_s8, %s2163_s8, %s2165_s9  }
  0x2d   : > { %s1822_s15 = sadd.s32 1, %s1703_s21   ;;  %s32_s16 = sadd.s32 1, %s1699_s20 }
  0x2e   : > { %s29_s17 = ssub.s32 %s1703_s21, %s1822_s15  ;;  %p39_p12 = scmp.ne.s32.totalorder %s1699_s20, %s1695_s19 }
  0x2f   : > { %p30_p13 = scmp.eq.s32.totalorder %s29_s17, 0  ;;  %p40_p0 = scmp.eq.s32.totalorder %s1703_s21, 0 }
  0x30   : > { %p1832_p5 = por %p158_p2, %p39_p12  ;;  %p1381_p10 = scmp.lt.s32.totalorder %s1703_s21, 2 }
  0x31   : > { %s1838_s27 = scalar_select %p30_p13, %s1699_s20, %s32_s16  }
  0x32   : > { %s2177_s23 = scalar_select %p1832_p5, 1, 0 }
  0x33   : > { %p41_p3 = por %p40_p0, %p39_p12  ;;  %s213_s28 = sand.u32 1, %s1699_s20  }
  0x34   : > { %s1148_s29 = sshll.u32 %s213_s28, 6  ;;  %s1231_s30 = sshll.u32 %s1703_s21, 10 }
  0x35   : > { %s2178_s0 = sld [smem:[#allocation16_spill]]  ;;  %s217_s11 = scalar_lea.vmem [#allocation2], %s1148_s29 }
  0x36   : > { %s224_s12 = sshll.u32 %s217_s11, 4  ;;  %p1849_p2 = pnand %p1381_p10, %p41_p3  ;;  %s1847_s12 = int_to_ptr.vmem [resolvable:$true] %s224_s12 }
  0x37   : > { %s1856_s17 = scalar_lea.hbm %s2158_s1, %s1231_s30  ;;  %s238_s6 = scalar_lea.vmem [#allocation5], %s1148_s29 }
  0x38   : > { %s1858_s7 = sshll.u32 %s238_s6, 4  ;;  %s1860_s8 = scalar_lea.sflag [#allocation3], %s213_s28  ;;  %s1891_s7 = int_to_ptr.vmem [resolvable:$true] %s1858_s7 }
  0x39   : > { %p1573_p7 = pneg %p1849_p2 }
  0x3b   : > { %s1845_s10 = scalar_lea.hbm %s2178_s0, %s1231_s30  ;;  %s1576_s14 = scalar_lea.hbm %s2178_s0, 2048 }
  0x3c   : > { %s1571_s9 = scalar_lea.hbm %s1845_s10, 1024  ;;  %p1577_p13 = scmp.lt.s32.totalorder %s1845_s10, %s2178_s0 }
  0x3d   : > { %p1572_p11 = scmp.ne.s32.totalorder %s1845_s10, %s1571_s9  ;;  %p1578_p0 = scmp.lt.s32.totalorder %s1576_s14, %s1571_s9 }
  0x3f   : > { %p1574_p9 = pnand %p1573_p7, %p1572_p11  ;;  %p1579_p10 = por %p1578_p0, %p1577_p13 }
  0x41   : > { %p1575_p12 = pneg %p1574_p9 }
  0x43   : > { %p1580_p3 = pnand %p1579_p10, %p1575_p12 }
  0x45   : > { %1583 = shalt.err (!%p1580_p3)
}
  0x46   : > { %s1584_s28 = scalar_lea.vmem %s1847_s12, 1024  ;;  %s1709_s2 = smov [#allocation2]  }
  0x47   : > { %p1585_p1 = scmp.ne.s32.totalorder %s1847_s12, %s1584_s28  ;;  %s1589_s29 = sshll.u32 %s1709_s2, 4  ;;  %s1590_s29 = int_to_ptr.vmem [resolvable:$false] %s1589_s29 }
  0x48   : > { %s1591_s6 = scalar_lea.vmem %s1590_s29, 2048  ;;  %p1592_p6 = scmp.lt.s32.totalorder %s1847_s12, %s1590_s29 }
  0x49   : > { %p1587_p11 = pnand %p1585_p1, %p1573_p7  ;;  %p1593_p5 = scmp.lt.s32.totalorder %s1591_s6, %s1584_s28 }
  0x4b   : > { %p1588_p9 = pneg %p1587_p11  ;;  %p1594_p4 = por %p1593_p5, %p1592_p6 }
  0x4d   : > { %p1595_p13 = pnand %p1594_p4, %p1588_p9 }
  0x4f   : > { %1598 = shalt.err (!%p1595_p13)
}
  0x50   : > { %s2180_s9 = smov 4   ;;  %s2181_s11 = smov 64  }
  0x51   : > { %1371 = dma.hbm_to_vmem [thread:$0]  (!%p1849_p2), %s1845_s10, 1024, %s1847_s12, %s1860_s8, %s2181_s11, %s2181_s11, %s2180_s9  }
  0x52   : > { %s234_s14 = sand.u32 1, %s1703_s21   ;;  %s1599_s30 = scalar_lea.hbm %s1856_s17, 1024 }
  0x53   : > { %s235_s16 = scalar_lea.sflag [#allocation6], %s234_s14  ;;  %p1600_p1 = scmp.ne.s32.totalorder %s1856_s17, %s1599_s30 }
  0x54   : > { %s1604_s29 = scalar_lea.hbm %s2158_s1, 2048  ;;  %p1605_p5 = scmp.lt.s32.totalorder %s1856_s17, %s2158_s1 }
  0x55   : > { %p1602_p4 = pnand %p1600_p1, %p1573_p7  ;;  %p1606_p12 = scmp.lt.s32.totalorder %s1604_s29, %s1599_s30 }
  0x57   : > { %p1603_p6 = pneg %p1602_p4  ;;  %p1607_p0 = por %p1606_p12, %p1605_p5 }
  0x59   : > { %p1608_p10 = pnand %p1607_p0, %p1603_p6 }
  0x5b   : > { %1611 = shalt.err (!%p1608_p10)
}
  0x5c   : > { %s1612_s8 = scalar_lea.vmem %s1891_s7, 1024  ;;  %s1710_s10 = smov [#allocation5]  }
  0x5d   : > { %p1613_p3 = scmp.ne.s32.totalorder %s1891_s7, %s1612_s8  ;;  %s1617_s12 = sshll.u32 %s1710_s10, 4  ;;  %s1618_s12 = int_to_ptr.vmem [resolvable:$false] %s1617_s12 }
  0x5e   : > { %s1619_s14 = scalar_lea.vmem %s1618_s12, 2048  ;;  %p1620_p13 = scmp.lt.s32.totalorder %s1891_s7, %s1618_s12 }
  0x5f   : > { %p1615_p11 = pnand %p1613_p3, %p1573_p7  ;;  %p1621_p1 = scmp.lt.s32.totalorder %s1619_s14, %s1612_s8 }
  0x61   : > { %p1616_p9 = pneg %p1615_p11  ;;  %p1622_p4 = por %p1621_p1, %p1620_p13 }
  0x63   : > { %p1623_p5 = pnand %p1622_p4, %p1616_p9 }
  0x65   : > { %1626 = shalt.err (!%p1623_p5)
}
  0x66   : > { %1374 = dma.hbm_to_vmem [thread:$0]  (!%p1849_p2), %s1856_s17, 1024, %s1891_s7, %s235_s16, %s2181_s11, %s2181_s11, %s2180_s9  }
  0x67   : > { %257 = sbr.rel (%p1784_p8) target bundleno = 431 (0x1af), region = 40  ;;  %s1922_s0 = sand.u32 (!%p1784_p8), 1, %s1695_s19  }
  0x68   : > { %s1155_s30 = sshll.u32 (!%p1784_p8), %s1922_s0, 6  ;;  %s260_s28 = scalar_lea.sflag (!%p1784_p8), [#allocation3], %s1922_s0 }
  0x69   : > { %s1926_s2 = scalar_lea.vmem (!%p1784_p8), [#allocation2], %s1155_s30  ;;  %p2182_p7 = scmp.ne.s32.totalorder (!%p1784_p8), %s2172_s24, 0 }
  0x6c   : > { %1670 = dma.done.wait (%p2182_p7), %s260_s28, 1024  }
  0x6d   : > { %1672 = vsyncadd (%p2182_p7), %s260_s28, 4294966272  ;;  %s268_s13 = sand.u32 1, %s1765_s22   ;;  %s1933_s17 = scalar_lea.vmem [#allocation5], %s1155_s30 }
  0x6e   : > { %s269_s26 = scalar_lea.sflag [#allocation6], %s268_s13 }
  0x6f   : > { %1674 = dma.done.wait (%p2182_p7), %s269_s26, 1024  }
  0x70   : > { %1676 = vsyncadd (%p2182_p7), %s269_s26, 4294966272  ;;  %p2183_p8 = scmp.eq.s32.totalorder %s1765_s22, 0 }
  0x72   : > { %1678 = dma.done.wait (%p2183_p8), [#allocation6], 1024   ;;  %p2184_p2 = pmov %p2183_p8 }
  0x74   : > { %1680 = vsyncadd (%p2184_p2), [#allocation6], 4294966272  ;;  %p2185_p6 = pmov %p2184_p2 }
  0x75   : > { %p2186_p12 = pmov %p2184_p2 }
  0x76   : > { %1682 = dma.done.wait (%p2185_p6), [#allocation9], 1024  }
  0x77   : > { %1684 = vsyncadd (%p2186_p12), [#allocation9], 4294966272  ;;  %v1423_v0 = vld [vmem:[#allocation8 + $0x38] sm:$0xff]   ;;  %v1425_v2 = vld [vmem:[#allocation8 + $0x30] sm:$0xff]   ;;  %s1159_s24 = sshll.u32 %s1922_s0, 7  ;;  %s1250_s16 = sshll.u32 %s1765_s22, 11 }
  0x78   : > { %v1424_v1 = vld [vmem:[#allocation7 + $0x38] sm:$0xff]   ;;  %1283 = vmatprep.subr.bf16.mxu0 %v1423_v0  ;;  %v1426_v3 = vld [vmem:[#allocation7 + $0x30] sm:$0xff]   ;;  %v1427_v4 = vld [vmem:[#allocation8 + $0x28] sm:$0xff]   ;;  %s1956_s7 = scalar_lea.vmem [#allocation10], %s1159_s24  ;;  %s2110_s10 = scalar_lea.hbm %s2162_s5, %s1250_s16 }
  0x79   : > { %1315 = vmatprep.subr.bf16.mxu1 %v1424_v1  ;;  %1284 = vmatpush3.bf16.msra.mxu0 %v1423_v0  ;;  %v1428_v5 = vld [vmem:[#allocation7 + $0x28] sm:$0xff]   ;;  %v1429_v6 = vld [vmem:[#allocation8 + $0x20] sm:$0xff]   ;;  %v1431_v8 = vld [vmem:[#allocation8 + $0x18] sm:$0xff]   ;;  %s1028_s29 = sshll.u32 %s1956_s7, 4  ;;  %s1014_s12 = scalar_lea.sflag [#allocation4], %s1922_s0  ;;  %s2112_s29 = int_to_ptr.vmem [resolvable:$true] %s1028_s29 }
  0x7a   : > { %1316 = vmatpush3.bf16.msra.mxu1 %v1424_v1  ;;  %1285 = vmatprep.subr.bf16.mxu0 %v1425_v2  ;;  %v1430_v7 = vld [vmem:[#allocation7 + $0x20] sm:$0xff]   ;;  %v1432_v9 = vld [vmem:[#allocation7 + $0x18] sm:$0xff]   ;;  %v1433_v10 = vld [vmem:[#allocation8 + $0x10] sm:$0xff]   ;;  %s1627_s22 = scalar_lea.vmem %s2112_s29, 2048  ;;  %p2187_p10 = scmp.ne.s32.totalorder %s2177_s23, 0 }
  0x7b   : > { %1317 = vmatprep.subr.bf16.mxu1 %v1426_v3  ;;  %v1434_v11 = vld [vmem:[#allocation7 + $0x10] sm:$0xff]   ;;  %v1949_v12 = vld [vmem:[%s1933_s17] sm:$0xf]  ;;  %v1952_v13 = vld [vmem:[%s1933_s17 + $0x4] sm:$0xf]  ;;  %p1628_p0 = scmp.ne.s32.totalorder %s2112_s29, %s1627_s22  ;;  %s1711_s14 = smov [#allocation10]  }
  0x7c   : > { %v1160_v14 = vcombine.low %v1949_v12, %v1952_v13  ;;  %885 = vst [vmem:[%s1956_s7] sm:$0xf] %v1949_v12  ;;  %886 = vst [vmem:[%s1956_s7 + $0x8] sm:$0xf] %v1952_v13  ;;  %v1440_v15 = vld [vmem:[%s1926_s2] sm:$0xff]   ;;  %v1964_v16 = vld [vmem:[%s1933_s17 + $0x8] sm:$0xf] }
  0x7d   : > { %1286 = vmatpush3.bf16.msra.mxu0 %v1425_v2  ;;  %v1967_v17 = vld [vmem:[%s1933_s17 + $0xc] sm:$0xf]  ;;  %887 = vst [vmem:[%s1956_s7 + $0x10] sm:$0xf] %v1964_v16  ;;  %v1974_v19 = vld [vmem:[%s1933_s17 + $0x10] sm:$0xf]  ;;  %1331 = vmatprep.mubr.bf16.mxu1 %v1440_v15  ;;  %p1629_p3 = pnand %p1628_p0, %p2187_p10 }
  0x7e   : > { %1318 = vmatpush3.bf16.msra.mxu1 %v1426_v3  ;;  %1287 = vmatprep.subr.bf16.mxu0 %v1427_v4  ;;  %v1435_v18 = vld [vmem:[#allocation8 + $0x8] sm:$0xff]   ;;  %888 = vst [vmem:[%s1956_s7 + $0x18] sm:$0xf] %v1967_v17  ;;  %v1977_v20 = vld [vmem:[%s1933_s17 + $0x14] sm:$0xf]  ;;  %v1437_v26 = vld [vmem:[#allocation8] sm:$0xff]   ;;  %v1161_v34 = vcombine.low %v1964_v16, %v1967_v17 }
  0x7f   : > { %1319 = vmatprep.subr.bf16.mxu1 %v1428_v5  ;;  %1299 = vmatprep.mubr.bf16.mxu0 %v1160_v14  ;;  %v1436_v21 = vld [vmem:[#allocation7 + $0x8] sm:$0xff]   ;;  %889 = vst [vmem:[%s1956_s7 + $0x20] sm:$0xf] %v1974_v19  ;;  %890 = vst [vmem:[%s1956_s7 + $0x28] sm:$0xf] %v1977_v20  ;;  %v1438_v29 = vld [vmem:[#allocation7] sm:$0xff]   ;;  %v1162_v36 = vcombine.low %v1974_v19, %v1977_v20  ;;  %p1630_p11 = pneg %p1629_p3 }
  0x80   : > { %v1984_v22 = vld [vmem:[%s1933_s17 + $0x18] sm:$0xf]  ;;  %v1987_v23 = vld [vmem:[%s1933_s17 + $0x1c] sm:$0xf]  ;;  %v1994_v24 = vld [vmem:[%s1933_s17 + $0x20] sm:$0xf] }
  0x81   : > { %1288 = vmatpush3.bf16.msra.mxu0 %v1427_v4  ;;  %891 = vst [vmem:[%s1956_s7 + $0x30] sm:$0xf] %v1984_v22  ;;  %892 = vst [vmem:[%s1956_s7 + $0x38] sm:$0xf] %v1987_v23  ;;  %v1997_v25 = vld [vmem:[%s1933_s17 + $0x24] sm:$0xf]  ;;  %v1163_v38 = vcombine.low %v1984_v22, %v1987_v23 }
  0x82   : > { %1320 = vmatpush3.bf16.msra.mxu1 %v1428_v5  ;;  %1289 = vmatprep.subr.bf16.mxu0 %v1429_v6  ;;  %893 = vst [vmem:[%s1956_s7 + $0x40] sm:$0xf] %v1994_v24  ;;  %894 = vst [vmem:[%s1956_s7 + $0x48] sm:$0xf] %v1997_v25  ;;  %v2004_v27 = vld [vmem:[%s1933_s17 + $0x28] sm:$0xf]  ;;  %v1164_v40 = vcombine.low %v1994_v24, %v1997_v25 }
  0x83   : > { %1321 = vmatprep.subr.bf16.mxu1 %v1430_v7  ;;  %v2007_v28 = vld [vmem:[%s1933_s17 + $0x2c] sm:$0xf]  ;;  %895 = vst [vmem:[%s1956_s7 + $0x50] sm:$0xf] %v2004_v27  ;;  %v2014_v30 = vld [vmem:[%s1933_s17 + $0x30] sm:$0xf] }
  0x84   : > { %896 = vst [vmem:[%s1956_s7 + $0x58] sm:$0xf] %v2007_v28  ;;  %v2017_v31 = vld [vmem:[%s1933_s17 + $0x34] sm:$0xf]  ;;  %897 = vst [vmem:[%s1956_s7 + $0x60] sm:$0xf] %v2014_v30  ;;  %v1165_v42 = vcombine.low %v2004_v27, %v2007_v28 }
  0x85   : > { %1290 = vmatpush3.bf16.msra.mxu0 %v1429_v6  ;;  %898 = vst [vmem:[%s1956_s7 + $0x68] sm:$0xf] %v2017_v31  ;;  %v2024_v32 = vld [vmem:[%s1933_s17 + $0x38] sm:$0xf]  ;;  %v2027_v33 = vld [vmem:[%s1933_s17 + $0x3c] sm:$0xf]  ;;  %v1166_v44 = vcombine.low %v2014_v30, %v2017_v31 }
  0x86   : > { %1322 = vmatpush3.bf16.msra.mxu1 %v1430_v7  ;;  %1291 = vmatprep.subr.bf16.mxu0 %v1431_v8  ;;  %899 = vst [vmem:[%s1956_s7 + $0x70] sm:$0xf] %v2024_v32  ;;  %900 = vst [vmem:[%s1956_s7 + $0x78] sm:$0xf] %v2027_v33  ;;  %v1442_v35 = vld [vmem:[%s1926_s2 + $0x8] sm:$0xff]   ;;  %v1444_v37 = vld [vmem:[%s1926_s2 + $0x10] sm:$0xff]   ;;  %v1167_v46 = vcombine.low %v2024_v32, %v2027_v33 }
  0x87   : > { %1323 = vmatprep.subr.bf16.mxu1 %v1432_v9  ;;  %v1446_v39 = vld [vmem:[%s1926_s2 + $0x18] sm:$0xff]   ;;  %v1448_v41 = vld [vmem:[%s1926_s2 + $0x20] sm:$0xff]   ;;  %v1450_v43 = vld [vmem:[%s1926_s2 + $0x28] sm:$0xff]   ;;  %s1631_s30 = sshll.u32 %s1711_s14, 4  ;;  %s1632_s30 = int_to_ptr.vmem [resolvable:$false] %s1631_s30 }
  0x88   : > { %v1452_v45 = vld [vmem:[%s1926_s2 + $0x30] sm:$0xff]   ;;  %v1454_v47 = vld [vmem:[%s1926_s2 + $0x38] sm:$0xff]   ;;  %v2057_v50 = vld [vmem:[%s2161_s4] ss:$0 sm:$0xff]  ;;  %s1633_s28 = scalar_lea.vmem %s1632_s30, 4096  ;;  %p1634_p9 = scmp.lt.s32.totalorder %s2112_s29, %s1632_s30 }
  0x89   : > { %1292 = vmatpush3.bf16.msra.mxu0 %v1431_v8  ;;  %p1635_p13 = scmp.lt.s32.totalorder %s1633_s28, %s1627_s22 }
  0x8a   : > { %1324 = vmatpush3.bf16.msra.mxu1 %v1432_v9  ;;  %1293 = vmatprep.subr.bf16.mxu0 %v1433_v10 }
  0x8b   : > { %1325 = vmatprep.subr.bf16.mxu1 %v1434_v11  ;;  %p1636_p1 = por %p1635_p13, %p1634_p9 }
  0x8d   : > { %1294 = vmatpush3.bf16.msra.mxu0 %v1433_v10  ;;  %p1637_p4 = pnand %p1636_p1, %p1630_p11 }
  0x8e   : > { %1326 = vmatpush3.bf16.msra.mxu1 %v1434_v11  ;;  %1295 = vmatprep.subr.bf16.mxu0 %v1435_v18 }
  0x8f   : > { %1327 = vmatprep.subr.bf16.mxu1 %v1436_v21 }
  0x91   : > { %1296 = vmatpush3.bf16.msra.mxu0 %v1435_v18 }
  0x92   : > { %1328 = vmatpush3.bf16.msra.mxu1 %v1436_v21  ;;  %1297 = vmatprep.subr.bf16.mxu0 %v1437_v26 }
  0x93   : > { %1329 = vmatprep.subr.bf16.mxu1 %v1438_v29 }
  0x95   : > { %1298 = vmatpush3.bf16.msra.mxu0 %v1437_v26 }
  0x96   : > { %1330 = vmatpush3.bf16.msra.mxu1 %v1438_v29 }
  0x98   : > { %1300 = vmatmul.mubr.bf16.vlgmr.msra.gmra.mxu0 %v1161_v34 }
  0x99   : > { %1332 = vmatmul.mubr.bf16.vlgmr.msra.gmra.mxu1 %v1442_v35  ;;  %1303 = vmatprep.mubr.bf16.mxu0 %v1162_v36 }
  0x9a   : > { %1335 = vmatprep.mubr.bf16.mxu1 %v1444_v37 }
  0xa0   : > { %1304 = vmatmul.mubr.bf16.gmra.mxu0 %v1163_v38 }
  0xa1   : > { %1336 = vmatmul.mubr.bf16.gmra.mxu1 %v1446_v39  ;;  %1307 = vmatprep.mubr.bf16.mxu0 %v1164_v40 }
  0xa2   : > { %1339 = vmatprep.mubr.bf16.mxu1 %v1448_v41 }
  0xa8   : > { %1308 = vmatmul.mubr.bf16.gmra.mxu0 %v1165_v42 }
  0xa9   : > { %1340 = vmatmul.mubr.bf16.gmra.mxu1 %v1450_v43  ;;  %1311 = vmatprep.mubr.bf16.mxu0 %v1166_v44 }
  0xaa   : > { %1343 = vmatprep.mubr.bf16.mxu1 %v1452_v45 }
  0xb0   : > { %1312 = vmatmul.mubr.bf16.gmra.mxu0 %v1167_v46 }
  0xb1   : > { %1344 = vmatmul.mubr.bf16.gmra.mxu1 %v1454_v47 }
 0x158   : > { %v1301_v48 = vpop.f32.mrf.mxu0 }
 0x159   : > { %v1333_v49 = vpop.f32.mrf.mxu1 }
 0x15a   : > { %v712_v51 = vadd.f32 %v1333_v49, %v1301_v48  ;;  %v510_v52 = vpop.f32.mrf.mxu0 }
 0x15b   : > { %v703_v53 = vpop.f32.mrf.mxu1 }
 0x15c   : > { %v775_v54 = vadd.f32 %v2057_v50, %v712_v51  ;;  %v704_v55 = vadd.f32 %v703_v53, %v510_v52  ;;  %v1302_v56 = vpop.f32.mrf.mxu0 }
 0x15d   : > { %v1334_v57 = vpop.f32.mrf.mxu1 }
 0x15e   : > { %v1195_v58 = vmul.f32 -1.442695, %v775_v54  ;;  %v773_v59 = vadd.f32 %v2057_v50, %v704_v55  ;;  %v715_v60 = vadd.f32 %v1334_v57, %v1302_v56  ;;  %v513_v61 = vpop.f32.mrf.mxu0 }
 0x15f   : > { %v706_v62 = vpop.f32.mrf.mxu1 }
 0x160   : > { %1455 = vpow2.f32 %v1195_v58  ;;  %v1193_v63 = vmul.f32 -1.442695, %v773_v59  ;;  %v776_v0 = vadd.f32 %v2057_v50, %v715_v60  ;;  %v707_v1 = vadd.f32 %v706_v62, %v513_v61  ;;  %v1305_v2 = vpop.f32.mrf.mxu0 }
 0x161   : > { %v1337_v3 = vpop.f32.mrf.mxu1 }
 0x162   : > { %1457 = vpow2.f32 %v1193_v63  ;;  %v1196_v4 = vmul.f32 -1.442695, %v776_v0  ;;  %v774_v5 = vadd.f32 %v2057_v50, %v707_v1  ;;  %v728_v6 = vadd.f32 %v1337_v3, %v1305_v2  ;;  %v526_v7 = vpop.f32.mrf.mxu0 }
 0x163   : > { %v719_v8 = vpop.f32.mrf.mxu1 }
 0x164   : > { %1459 = vpow2.f32 %v1196_v4  ;;  %v1194_v9 = vmul.f32 -1.442695, %v774_v5  ;;  %v779_v10 = vadd.f32 %v2057_v50, %v728_v6  ;;  %v720_v11 = vadd.f32 %v719_v8, %v526_v7  ;;  %v1306_v14 = vpop.f32.mrf.mxu0 }
 0x165   : > { %v1338_v15 = vpop.f32.mrf.mxu1 }
 0x166   : > { %1461 = vpow2.f32 %v1194_v9  ;;  %v1199_v18 = vmul.f32 -1.442695, %v779_v10  ;;  %v777_v21 = vadd.f32 %v2057_v50, %v720_v11  ;;  %v731_v26 = vadd.f32 %v1338_v15, %v1306_v14  ;;  %v529_v29 = vpop.f32.mrf.mxu0 }
 0x167   : > { %v722_v34 = vpop.f32.mrf.mxu1 }
 0x168   : > { %1463 = vpow2.f32 %v1199_v18  ;;  %v1197_v35 = vmul.f32 -1.442695, %v777_v21  ;;  %v780_v36 = vadd.f32 %v2057_v50, %v731_v26  ;;  %v723_v37 = vadd.f32 %v722_v34, %v529_v29  ;;  %v1309_v38 = vpop.f32.mrf.mxu0 }
 0x169   : > { %v1341_v39 = vpop.f32.mrf.mxu1 }
 0x16a   : > { %1465 = vpow2.f32 %v1197_v35  ;;  %v1200_v40 = vmul.f32 -1.442695, %v780_v36  ;;  %v778_v41 = vadd.f32 %v2057_v50, %v723_v37  ;;  %v744_v42 = vadd.f32 %v1341_v39, %v1309_v38  ;;  %v542_v43 = vpop.f32.mrf.mxu0 }
 0x16b   : > { %v735_v44 = vpop.f32.mrf.mxu1 }
 0x16c   : > { %1467 = vpow2.f32 %v1200_v40  ;;  %v1198_v45 = vmul.f32 -1.442695, %v778_v41  ;;  %v783_v46 = vadd.f32 %v2057_v50, %v744_v42  ;;  %v736_v47 = vadd.f32 %v735_v44, %v542_v43  ;;  %v1310_v48 = vpop.f32.mrf.mxu0 }
 0x16d   : > { %v1456_v49 = vpop.eup %1455  ;;  %v1342_v51 = vpop.f32.mrf.mxu1  ;;  %v903_v43 = vunpack.c.l.bf16 %v1964_v16  ;;  %v904_v16 = vunpack.c.l.bf16 %v1967_v17 }
 0x16e   : > { %v839_v52 = vadd.f32 1.0, %v1456_v49  ;;  %1469 = vpow2.f32 %v1198_v45  ;;  %v1203_v53 = vmul.f32 -1.442695, %v783_v46  ;;  %v781_v54 = vadd.f32 %v2057_v50, %v736_v47  ;;  %v545_v55 = vpop.f32.mrf.mxu0 }
 0x16f   : > { %v1458_v56 = vpop.eup %1457  ;;  %v747_v57 = vadd.f32 %v1342_v51, %v1310_v48  ;;  %v738_v58 = vpop.f32.mrf.mxu1  ;;  %v901_v49 = vunpack.c.l.bf16 %v1949_v12 }
 0x170   : > { %1471 = vrcp.f32 %v839_v52  ;;  %v837_v59 = vadd.f32 1.0, %v1458_v56  ;;  %v1201_v60 = vmul.f32 -1.442695, %v781_v54  ;;  %v739_v61 = vadd.f32 %v738_v58, %v545_v55  ;;  %v1313_v62 = vpop.f32.mrf.mxu0 }
 0x171   : > { %v1460_v63 = vpop.eup %1459  ;;  %1473 = vpow2.f32 %v1203_v53  ;;  %v784_v0 = vadd.f32 %v2057_v50, %v747_v57  ;;  %v1345_v1 = vpop.f32.mrf.mxu1 }
 0x172   : > { %1475 = vrcp.f32 %v837_v59  ;;  %v840_v2 = vadd.f32 1.0, %v1460_v63  ;;  %v782_v3 = vadd.f32 %v2057_v50, %v739_v61  ;;  %v760_v4 = vadd.f32 %v1345_v1, %v1313_v62  ;;  %v558_v5 = vpop.f32.mrf.mxu0 }
 0x173   : > { %v1462_v6 = vpop.eup %1461  ;;  %1477 = vpow2.f32 %v1201_v60  ;;  %v1204_v7 = vmul.f32 -1.442695, %v784_v0  ;;  %v751_v8 = vpop.f32.mrf.mxu1  ;;  %v907_v63 = vunpack.c.l.bf16 %v1984_v22  ;;  %v908_v22 = vunpack.c.l.bf16 %v1987_v23 }
 0x174   : > { %1479 = vrcp.f32 %v840_v2  ;;  %v838_v9 = vadd.f32 1.0, %v1462_v6  ;;  %v1202_v10 = vmul.f32 -1.442695, %v782_v3  ;;  %v787_v11 = vadd.f32 %v2057_v50, %v760_v4  ;;  %v1314_v14 = vpop.f32.mrf.mxu0 }
 0x175   : > { %v1464_v15 = vpop.eup %1463  ;;  %1481 = vpow2.f32 %v1204_v7  ;;  %v752_v18 = vadd.f32 %v751_v8, %v558_v5  ;;  %v1346_v21 = vpop.f32.mrf.mxu1  ;;  %v905_v4 = vunpack.c.l.bf16 %v1974_v19  ;;  %v906_v19 = vunpack.c.l.bf16 %v1977_v20 }
 0x176   : > { %1483 = vrcp.f32 %v838_v9  ;;  %v843_v26 = vadd.f32 1.0, %v1464_v15  ;;  %v1207_v29 = vmul.f32 -1.442695, %v787_v11  ;;  %v763_v34 = vadd.f32 %v1346_v21, %v1314_v14  ;;  %v561_v35 = vpop.f32.mrf.mxu0 }
 0x177   : > { %v1466_v36 = vpop.eup %1465  ;;  %1485 = vpow2.f32 %v1202_v10  ;;  %v785_v37 = vadd.f32 %v2057_v50, %v752_v18  ;;  %v754_v38 = vpop.f32.mrf.mxu1 }
 0x178   : > { %1487 = vrcp.f32 %v843_v26  ;;  %v841_v39 = vadd.f32 1.0, %v1466_v36  ;;  %v788_v40 = vadd.f32 %v2057_v50, %v763_v34  ;;  %v755_v41 = vadd.f32 %v754_v38, %v561_v35 }
 0x179   : > { %v1468_v42 = vpop.eup %1467  ;;  %1489 = vpow2.f32 %v1207_v29  ;;  %v1205_v44 = vmul.f32 -1.442695, %v785_v37  ;;  %v911_v37 = vunpack.c.l.bf16 %v2004_v27 }
 0x17a   : > { %1491 = vrcp.f32 %v841_v39  ;;  %v844_v45 = vadd.f32 1.0, %v1468_v42  ;;  %v1208_v46 = vmul.f32 -1.442695, %v788_v40  ;;  %v786_v47 = vadd.f32 %v2057_v50, %v755_v41 }
 0x17b   : > { %v1470_v48 = vpop.eup %1469  ;;  %1493 = vpow2.f32 %v1205_v44  ;;  %v902_v50 = vunpack.c.l.bf16 %v1952_v13  ;;  %v909_v41 = vunpack.c.l.bf16 %v1994_v24  ;;  %v915_v24 = vunpack.c.l.bf16 %v2024_v32 }
 0x17c   : > { %1495 = vrcp.f32 %v844_v45  ;;  %v842_v51 = vadd.f32 1.0, %v1470_v48  ;;  %v1206_v52 = vmul.f32 -1.442695, %v786_v47  ;;  %v912_v45 = vunpack.c.l.bf16 %v2007_v28 }
 0x17d   : > { %v1472_v53 = vpop.eup %1471  ;;  %1497 = vpow2.f32 %v1208_v46  ;;  %v910_v47 = vunpack.c.l.bf16 %v1997_v25  ;;  %v913_v28 = vunpack.c.l.bf16 %v2014_v30  ;;  %v916_v25 = vunpack.c.l.bf16 %v2027_v33 }
 0x17e   : > { %v1474_v54 = vpop.eup %1473  ;;  %v919_v55 = vmul.f32 %v1472_v53, %v903_v43  ;;  %1499 = vrcp.f32 %v842_v51 }
 0x17f   : > { %v1476_v56 = vpop.eup %1475  ;;  %v847_v57 = vadd.f32 1.0, %v1474_v54  ;;  %1501 = vpow2.f32 %v1206_v52 }
 0x180   : > { %v1478_v58 = vpop.eup %1477  ;;  %v1235_v59 = vpack.c.bf16 %v919_v55, %v919_v55  ;;  %v917_v12 = vmul.f32 %v1476_v56, %v901_v49 }
 0x181   : > { %v1480_v60 = vpop.eup %1479  ;;  %1503 = vrcp.f32 %v847_v57  ;;  %v845_v61 = vadd.f32 1.0, %v1478_v58 }
 0x182   : > { %v1482_v62 = vpop.eup %1481  ;;  %999 = vst [vmem:[%s1956_s7 + $0x14] sm:$0xf] %v1235_v59  ;;  %v1233_v17 = vpack.c.bf16 %v917_v12, %v917_v12  ;;  %v920_v0 = vmul.f32 %v1480_v60, %v904_v16 }
 0x183   : > { %v1484_v1 = vpop.eup %1483  ;;  %1505 = vrcp.f32 %v845_v61  ;;  %v848_v2 = vadd.f32 1.0, %v1482_v62 }
 0x184   : > { %v1486_v3 = vpop.eup %1485  ;;  %997 = vst [vmem:[%s1956_s7 + $0x4] sm:$0xf] %v1233_v17  ;;  %v1236_v13 = vpack.c.bf16 %v920_v0, %v920_v0  ;;  %v918_v5 = vmul.f32 %v1484_v1, %v902_v50  ;;  %v914_v50 = vunpack.c.l.bf16 %v2017_v31 }
 0x185   : > { %v1488_v6 = vpop.eup %1487  ;;  %1507 = vrcp.f32 %v848_v2  ;;  %v846_v7 = vadd.f32 1.0, %v1486_v3 }
 0x186   : > { %v1490_v8 = vpop.eup %1489  ;;  %1000 = vst [vmem:[%s1956_s7 + $0x1c] sm:$0xf] %v1236_v13  ;;  %v1234_v9 = vpack.c.bf16 %v918_v5, %v918_v5  ;;  %v923_v10 = vmul.f32 %v1488_v6, %v907_v63 }
 0x187   : > { %v1492_v11 = vpop.eup %1491  ;;  %1509 = vrcp.f32 %v846_v7  ;;  %v851_v14 = vadd.f32 1.0, %v1490_v8 }
 0x188   : > { %v1494_v15 = vpop.eup %1493  ;;  %998 = vst [vmem:[%s1956_s7 + $0xc] sm:$0xf] %v1234_v9  ;;  %v1239_v18 = vpack.c.bf16 %v923_v10, %v923_v10  ;;  %v921_v21 = vmul.f32 %v1492_v11, %v905_v4 }
 0x189   : > { %v1496_v26 = vpop.eup %1495  ;;  %1511 = vrcp.f32 %v851_v14  ;;  %v849_v29 = vadd.f32 1.0, %v1494_v15 }
 0x18a   : > { %v1498_v34 = vpop.eup %1497  ;;  %1003 = vst [vmem:[%s1956_s7 + $0x34] sm:$0xf] %v1239_v18  ;;  %v1237_v23 = vpack.c.bf16 %v921_v21, %v921_v21  ;;  %v924_v35 = vmul.f32 %v1496_v26, %v908_v22 }
 0x18b   : > { %v1500_v36 = vpop.eup %1499  ;;  %1513 = vrcp.f32 %v849_v29  ;;  %v852_v38 = vadd.f32 1.0, %v1498_v34 }
 0x18c   : > { %v1502_v39 = vpop.eup %1501  ;;  %1001 = vst [vmem:[%s1956_s7 + $0x24] sm:$0xf] %v1237_v23  ;;  %v1240_v20 = vpack.c.bf16 %v924_v35, %v924_v35  ;;  %v922_v40 = vmul.f32 %v1500_v36, %v906_v19 }
 0x18d   : > { %1515 = vrcp.f32 %v852_v38  ;;  %v850_v42 = vadd.f32 1.0, %v1502_v39 }
 0x18e   : > { %v1504_v43 = vpop.eup %1503  ;;  %1004 = vst [vmem:[%s1956_s7 + $0x3c] sm:$0xf] %v1240_v20  ;;  %v1238_v44 = vpack.c.bf16 %v922_v40, %v922_v40 }
 0x18f   : > { %v927_v46 = vmul.f32 %v1504_v43, %v911_v37  ;;  %1517 = vrcp.f32 %v850_v42 }
 0x190   : > { %v1506_v27 = vpop.eup %1505  ;;  %1002 = vst [vmem:[%s1956_s7 + $0x2c] sm:$0xf] %v1238_v44 }
 0x191   : > { %v1243_v48 = vpack.c.bf16 %v927_v46, %v927_v46  ;;  %v925_v49 = vmul.f32 %v1506_v27, %v909_v41 }
 0x192   : > { %v1508_v51 = vpop.eup %1507 }
 0x193   : > { %1007 = vst [vmem:[%s1956_s7 + $0x54] sm:$0xf] %v1243_v48  ;;  %v1241_v52 = vpack.c.bf16 %v925_v49, %v925_v49  ;;  %v928_v53 = vmul.f32 %v1508_v51, %v912_v45 }
 0x194   : > { %v1510_v54 = vpop.eup %1509 }
 0x195   : > { %1005 = vst [vmem:[%s1956_s7 + $0x44] sm:$0xf] %v1241_v52  ;;  %v1244_v16 = vpack.c.bf16 %v928_v53, %v928_v53  ;;  %v926_v55 = vmul.f32 %v1510_v54, %v910_v47 }
 0x196   : > { %v1512_v56 = vpop.eup %1511 }
 0x197   : > { %1008 = vst [vmem:[%s1956_s7 + $0x5c] sm:$0xf] %v1244_v16  ;;  %v1242_v57 = vpack.c.bf16 %v926_v55, %v926_v55  ;;  %v931_v32 = vmul.f32 %v1512_v56, %v915_v24 }
 0x198   : > { %v1514_v58 = vpop.eup %1513 }
 0x199   : > { %1006 = vst [vmem:[%s1956_s7 + $0x4c] sm:$0xf] %v1242_v57  ;;  %v1247_v59 = vpack.c.bf16 %v931_v32, %v931_v32  ;;  %v929_v30 = vmul.f32 %v1514_v58, %v913_v28 }
 0x19a   : > { %v1516_v12 = vpop.eup %1515 }
 0x19b   : > { %1011 = vst [vmem:[%s1956_s7 + $0x74] sm:$0xf] %v1247_v59  ;;  %v1245_v60 = vpack.c.bf16 %v929_v30, %v929_v30  ;;  %v932_v61 = vmul.f32 %v1516_v12, %v916_v25 }
 0x19c   : > { %v1518_v33 = vpop.eup %1517 }
 0x19d   : > { %1009 = vst [vmem:[%s1956_s7 + $0x64] sm:$0xf] %v1245_v60  ;;  %v1248_v62 = vpack.c.bf16 %v932_v61, %v932_v61  ;;  %v930_v63 = vmul.f32 %v1518_v33, %v914_v50 }
 0x19f   : > { %1012 = vst [vmem:[%s1956_s7 + $0x7c] sm:$0xf] %v1248_v62  ;;  %v1246_v31 = vpack.c.bf16 %v930_v63, %v930_v63 }
 0x1a1   : > { %1010 = vst [vmem:[%s1956_s7 + $0x6c] sm:$0xf] %v1246_v31 }
 0x1a2   : > { %1640 = shalt.err (!%p1637_p4)
}
 0x1a3   : > { %s1641_s2 = scalar_lea.hbm %s2110_s10, 2048  ;;  %s1645_s17 = scalar_lea.hbm %s2162_s5, 4096 }
 0x1a4   : > { %p1642_p5 = scmp.ne.s32.totalorder %s2110_s10, %s1641_s2  ;;  %p1646_p2 = scmp.lt.s32.totalorder %s2110_s10, %s2162_s5 }
 0x1a5   : > { %p1647_p6 = scmp.lt.s32.totalorder %s1645_s17, %s1641_s2 }
 0x1a6   : > { %p1643_p7 = pnand %p1642_p5, %p2187_p10 }
 0x1a7   : > { %p1648_p12 = por %p1647_p6, %p1646_p2 }
 0x1a8   : > { %p1644_p8 = pneg %p1643_p7 }
 0x1aa   : > { %p1649_p0 = pnand %p1648_p12, %p1644_p8 }
 0x1ac   : > { %1652 = shalt.err (!%p1649_p0)
}
 0x1ad   : > { %s1712_s9 = smov 128   ;;  %s1713_s11 = smov 8  }
 0x1ae   : > { %1359 = dma.vmem_to_hbm [thread:$0]  (%p2187_p10), %s2112_s29, 2048, %s2110_s10, %s1014_s12, %s1712_s9, %s1712_s9, %s1713_s11  }
 0x1af PF: > { %s1043_s16 = sand.u32 1, %s1691_s18   ;;  %p2188_p3 = scmp.ne.s32.totalorder %s2173_s25, 0 }
 0x1b0   : > { %p2189_p11 = scmp.ge.s32.totalorder %s1703_s21, 2  ;;  %s1044_s6 = scalar_lea.sflag [#allocation4], %s1043_s16 }
 0x1b2   : > { %p1376_p9 = pnand %p2189_p11, %p2188_p3 }
 0x1b4   : > { %p1377_p13 = pneg %p1376_p9 }
 0x1b6   : > { %1686 = dma.done.wait (%p1377_p13), %s1044_s6, 2048  }
 0x1b7   : > { %1688 = vsyncadd (%p1377_p13), %s1044_s6, 4294965248  ;;  %p22_p1 = scmp.ge.s32.totalorder %s1822_s15, 4   ;;  %s2190_s18 = smov %s1695_s19 }
 0x1b8   : > { %s2191_s19 = smov %s1699_s20  ;;  %s2192_s20 = smov %s1838_s27 }
 0x1b9   : > { %s2193_s21 = smov %s1822_s15  ;;  %24 = sbr.rel (!%p22_p1) target bundleno = 11 (0xb), region = 106 }
 0x1be   :  { %1049 = vsyncpa [#allocation3], 1 }
 0x1bf   :  { %1051 = vsyncpa [#allocation3 + $0x1], 1 }
 0x1c0   :  { %1052 = vsyncpa [#allocation6], 1 }
 0x1c1   :  { %1054 = vsyncpa [#allocation6 + $0x1], 1 }
 0x1c2   :  { %1055 = vsyncpa [#allocation9], 1 }
 0x1c3   :  { %1056 = vsyncpa [#allocation4], 1 }
 0x1c4   :  { %1058 = vsyncpa [#allocation4 + $0x1], 1 }

</bundles_post_ra>
